<compile_context>
chip_gen: v6e
topology: v6e:2x2x1
jax: 0.10.0
libtpu: 0.0.40
codegen_flags: <defaults>
</compile_context>

<pallas_src>
import functools

import jax
import jax.numpy as jnp
from jax import lax
from jax.experimental import pallas as pl
from jax.experimental.pallas import tpu as pltpu


def _conv_bias_relu_kernel(x_ref, w_ref, o_ref, xe_ref, patch_ref, *,
                           kh, kw, c_in, tb, dilation, padding, w_img, hw,
                           pad_lanes):
    """TB batch images per grid step, lane-dense (C, H*W) layout.

    x_ref:     (TB, C_in, HW)                      flat input planes (VMEM)
    w_ref:     (C_out, KH*KW*C_in + 1)             im2col weights + bias column (VMEM)
    o_ref:     (TB, C_out, HW)                     flat output planes (VMEM)
    xe_ref:    (TB*C_in, HW + 2*pad_lanes)         zero-extended input planes (scratch)
    patch_ref: (KH*KW*C_in + 1, TB*HW)             im2col patches + ones row (scratch)
    """
    f32 = jnp.float32
    ktaps = kh * kw

    # Zero only the two lane-tile-aligned pad strips; the middle (image) region
    # is fully overwritten below, every step.  (Cheap: a couple of small stores.)
    xe_ref[:, :pad_lanes] = jnp.zeros((tb * c_in, pad_lanes), f32)
    xe_ref[:, pad_lanes + hw:] = jnp.zeros((tb * c_in, pad_lanes), f32)

    # Copy flat input planes into the zero-extended scratch (lane-aligned store).
    for t in range(tb):
        r0 = t * c_in
        xe_ref[r0:r0 + c_in, pad_lanes:pad_lanes + hw] = x_ref[t].astype(f32)

    # Constant ones row so the bias column of w_ref is applied by the MXU.
    patch_ref[ktaps * c_in:ktaps * c_in + 1, :] = jnp.ones((1, tb * hw), f32)

    # Left/right border validity masks, generated in-kernel (no HBM input) and
    # pre-broadcast to (C_in, HW) once per step, outside the tap loop.  Taps
    # with dw == 0 need no mask at all.
    col = lax.broadcasted_iota(jnp.int32, (c_in, hw), 1) % w_img
    masks = {}
    for iw in range(kw):
        dw = iw * dilation - padding
        if dw != 0:
            masks[iw] = (((col + dw) >= 0) & ((col + dw) < w_img)).astype(f32)

    # im2col: pack all KH*KW taps of all TB images into one (K, TB*HW) matrix.
    # Every tap is a static lane slice of the zero-extended plane (out-of-image
    # rows read zeros from the pad strips).
    for t in range(tb):
        r0 = t * c_in
        c0 = t * hw
        for ih in range(kh):
            dh = ih * dilation - padding
            for iw in range(kw):
                dw = iw * dilation - padding
                start = pad_lanes + dh * w_img + dw          # static lane offset
                win = xe_ref[r0:r0 + c_in, start:start + hw]  # (C_in, HW)
                if iw in masks:
                    win = win * masks[iw]
                tap = ih * kw + iw
                patch_ref[tap * c_in:(tap + 1) * c_in, c0:c0 + hw] = win

    # Single MXU contraction over K = KH*KW*C_in + 1 (bias folded in), then ReLU.
    acc = jnp.dot(w_ref[...], patch_ref[...],
                  preferred_element_type=jnp.float32)        # (C_out, TB*HW)
    acc = jnp.maximum(acc, 0.0)

    # Lane-dense, unmasked output stores (HW is a multiple of 128).
    for t in range(tb):
        o_ref[t] = acc[:, t * hw:(t + 1) * hw].astype(o_ref.dtype)


def conv2d_block_pallas(x_nchw, weight_oihw, bias, *, stride, padding,
                        dilation):
    """Forward pass of Conv2dBlock. Input NCHW, returns NCHW (like PyTorch)."""
    n, c_in, h, w = x_nchw.shape
    c_out, c_in_w, kh, kw = weight_oihw.shape
    assert c_in == c_in_w

    h_out = (h + 2 * padding - dilation * (kh - 1) - 1) // stride + 1
    w_out = (w + 2 * padding - dilation * (kw - 1) - 1) // stride + 1
    # TODO(synk): general stride / non-"same" padding would need a strided/cropped
    # epilogue; this kernel covers the stride-1 "same" configuration of the module.
    assert stride == 1 and h_out == h and w_out == w, (
        "Pallas kernel implemented for stride-1 'same' convolutions "
        "(2*padding == dilation*(kernel_size-1)).")

    hw = h * w
    ktaps = kh * kw

    # Batch tiling: keep >= 2 grid steps when possible (both v7x TensorCores get
    # a step), fuse TB images per step to amortize the ~0.35us per-step overhead,
    # and cap TB so per-step VMEM (~70 KB/image incl. double-buffered blocks)
    # stays far below the scoped VMEM limits of every generation.
    num_steps = 2 if n >= 2 else 1
    tb = min(max(1, (n + num_steps - 1) // num_steps), 256)
    num_steps = (n + tb - 1) // tb
    n_pad = num_steps * tb

    # Free flat view (contiguous reshape; no HBM transpose / spatial pad passes).
    x_flat = x_nchw.reshape(n, c_in, hw)
    if n_pad != n:
        x_flat = jnp.pad(x_flat, ((0, n_pad - n), (0, 0), (0, 0)))

    # (O, I, KH, KW) -> (O, KH*KW*I) matching patch row order (tap-major, then
    # C_in), with the bias appended as an extra K column (patch supplies a ones
    # row), so the bias add rides the MXU for free.
    w2 = jnp.transpose(weight_oihw, (0, 2, 3, 1)).reshape(c_out, ktaps * c_in)
    w_ext = jnp.concatenate([w2, bias.reshape(c_out, 1)],
                            axis=1).astype(jnp.float32)      # (C_out, K+1)

    max_shift = max(
        abs((ih * dilation - padding) * w + (iw * dilation - padding))
        for ih in range(kh) for iw in range(kw))
    pad_lanes = max(128, ((max_shift + 127) // 128) * 128)   # lane-tile aligned

    kernel = functools.partial(
        _conv_bias_relu_kernel, kh=kh, kw=kw, c_in=c_in, tb=tb,
        dilation=dilation, padding=padding, w_img=w, hw=hw,
        pad_lanes=pad_lanes)

    out_flat = pl.pallas_call(
        kernel,
        out_shape=jax.ShapeDtypeStruct((n_pad, c_out, hw), x_nchw.dtype),
        grid_spec=pltpu.PrefetchScalarGridSpec(
            num_scalar_prefetch=0,
            grid=(num_steps,),
            in_specs=[
                pl.BlockSpec((tb, c_in, hw), lambda b: (b, 0, 0)),
                pl.BlockSpec((c_out, ktaps * c_in + 1), lambda b: (0, 0)),
            ],
            out_specs=pl.BlockSpec((tb, c_out, hw), lambda b: (b, 0, 0)),
            scratch_shapes=[
                # Zero-extended input planes + im2col patch matrix.  For the
                # tested config (TB=1) this is ~50 KB; TB is capped so even
                # large batches stay well under the v7x 32 MiB scoped default.
                pltpu.VMEM((tb * c_in, hw + 2 * pad_lanes), jnp.float32),
                pltpu.VMEM((ktaps * c_in + 1, tb * hw), jnp.float32),
            ],
        ),
        compiler_params=pltpu.CompilerParams(
            dimension_semantics=("parallel",)),
    )(x_flat, w_ext)

    # Dropout2d: identity (eval mode).  Output is already NCHW-flat; free reshape.
    out_flat = out_flat[:n]
    return out_flat.reshape(n, c_out, h_out, w_out)


def _reference(x_nchw, weight_oihw, bias, *, stride, padding, dilation):
    y = lax.conv_general_dilated(
        x_nchw.astype(jnp.float32), weight_oihw.astype(jnp.float32),
        window_strides=(stride, stride),
        padding=((padding, padding), (padding, padding)),
        rhs_dilation=(dilation, dilation),
        dimension_numbers=("NCHW", "OIHW", "NCHW"))
    y = y + bias.astype(jnp.float32)[None, :, None, None]
    return jnp.maximum(y, 0.0)


if __name__ == "__main__":
    # Module hyper-parameters (deterministic, in-script).
    in_channels, out_channels = 4, 8
    kernel_size, stride, padding, dilation = 3, 1, 1, 1

    key = jax.random.PRNGKey(0)
    kx, kw_, kb = jax.random.split(key, 3)

    x = jax.random.normal(kx, (2, in_channels, 16, 16), dtype=jnp.float32)
    weight = jax.random.normal(
        kw_, (out_channels, in_channels, kernel_size, kernel_size),
        dtype=jnp.float32) * 0.1
    bias = jax.random.normal(kb, (out_channels,), dtype=jnp.float32) * 0.1

    out = conv2d_block_pallas(x, weight, bias, stride=stride, padding=padding,
                              dilation=dilation)
    out = jax.block_until_ready(out)

    ref = _reference(x, weight, bias, stride=stride, padding=padding,
                     dilation=dilation)
    assert out.shape == ref.shape
    assert jnp.allclose(out, ref, atol=1e-4, rtol=1e-4), "mismatch vs reference"

    print("KERNEL_OK")
</pallas_src>

<mosaic_0001>
module attributes {stable_mosaic.version = 11 : i64} {
  func.func @_conv_bias_relu_kernel(%arg0: i32, %arg1: memref<1x4x256xf32, #tpu.memory_space<vmem>>, %arg2: memref<8x37xf32, #tpu.memory_space<vmem>>, %arg3: memref<1x8x256xf32, #tpu.memory_space<vmem>>, %arg4: memref<4x512xf32, #tpu.memory_space<vmem>>, %arg5: memref<37x256xf32, #tpu.memory_space<vmem>>) attributes {dimension_semantics = [#tpu.dimension_semantics<parallel>], iteration_bounds = array<i64: 2>, scalar_prefetch = 0 : i64, scratch_operands = 2 : i64, tpu.core_type = #tpu.core_type<tc>, window_params = [{transform_indices = @transform_0, window_bounds = array<i64: 1, 4, 256>}, {pipeline_mode = #tpu.pipeline_mode<synchronous>, transform_indices = @transform_1, window_bounds = array<i64: 8, 37>}, {transform_indices = @transform_2, window_bounds = array<i64: 1, 8, 256>}]} {
    %cst = arith.constant 0.000000e+00 : f32
    %0 = vector.broadcast %cst : f32 to vector<4x128xf32>
    %c0 = arith.constant 0 : index
    %c0_0 = arith.constant 0 : index
    %1 = vector.load %arg4[%c0, %c0_0] : memref<4x512xf32, #tpu.memory_space<vmem>>, vector<4x128xf32>
    tpu.vector_store %arg4[%c0, %c0_0], %0 {strides = array<i32>} : memref<4x512xf32, #tpu.memory_space<vmem>>, vector<4x128xf32>,
    %cst_1 = arith.constant 0.000000e+00 : f32
    %2 = vector.broadcast %cst_1 : f32 to vector<4x128xf32>
    %c0_2 = arith.constant 0 : index
    %c384 = arith.constant 384 : index
    %3 = vector.load %arg4[%c0_2, %c384] : memref<4x512xf32, #tpu.memory_space<vmem>>, vector<4x128xf32>
    tpu.vector_store %arg4[%c0_2, %c384], %2 {strides = array<i32>} : memref<4x512xf32, #tpu.memory_space<vmem>>, vector<4x128xf32>,
    %c0_3 = arith.constant 0 : index
    %c0_4 = arith.constant 0 : index
    %c0_5 = arith.constant 0 : index
    %4 = vector.load %arg1[%c0_3, %c0_4, %c0_5] : memref<1x4x256xf32, #tpu.memory_space<vmem>>, vector<1x4x256xf32>
    %5 = vector.shape_cast %4 : vector<1x4x256xf32> to vector<4x256xf32>
    %c0_6 = arith.constant 0 : index
    %c128 = arith.constant 128 : index
    %6 = vector.load %arg4[%c0_6, %c128] : memref<4x512xf32, #tpu.memory_space<vmem>>, vector<4x256xf32>
    tpu.vector_store %arg4[%c0_6, %c128], %5 {strides = array<i32>} : memref<4x512xf32, #tpu.memory_space<vmem>>, vector<4x256xf32>,
    %cst_7 = arith.constant 1.000000e+00 : f32
    %7 = vector.broadcast %cst_7 : f32 to vector<1x256xf32>
    %c36 = arith.constant 36 : index
    %c0_8 = arith.constant 0 : index
    %8 = vector.load %arg5[%c36, %c0_8] : memref<37x256xf32, #tpu.memory_space<vmem>>, vector<1x256xf32>
    tpu.vector_store %arg5[%c36, %c0_8], %7 {strides = array<i32>} : memref<37x256xf32, #tpu.memory_space<vmem>>, vector<1x256xf32>,
    %9 = tpu.iota {dimensions = array<i32: 1>} : vector<4x256xi32>
    %c16_i32 = arith.constant 16 : i32
    %c0_i32 = arith.constant 0 : i32
    %10 = arith.cmpi eq, %c16_i32, %c0_i32 : i32
    %c1_i32 = arith.constant 1 : i32
    %11 = arith.select %10, %c1_i32, %c16_i32 : i32
    %12 = vector.broadcast %11 : i32 to vector<4x256xi32>
    %13 = arith.remsi %9, %12 : vector<4x256xi32>
    %c0_i32_9 = arith.constant 0 : i32
    %14 = vector.broadcast %c0_i32_9 : i32 to vector<4x256xi32>
    %15 = arith.cmpi ne, %13, %14 : vector<4x256xi32>
    %c0_i32_10 = arith.constant 0 : i32
    %16 = vector.broadcast %c0_i32_10 : i32 to vector<4x256xi32>
    %17 = arith.cmpi slt, %13, %16 : vector<4x256xi32>
    %c0_i32_11 = arith.constant 0 : i32
    %18 = arith.cmpi slt, %11, %c0_i32_11 : i32
    %19 = vector.broadcast %18 : i1 to vector<4x256xi1>
    %20 = vector.broadcast %19 : vector<4x256xi1> to vector<4x256xi1>
    %21 = arith.xori %17, %20 : vector<4x256xi1>
    %22 = arith.andi %21, %15 : vector<4x256xi1>
    %23 = vector.broadcast %11 : i32 to vector<4x256xi32>
    %24 = arith.addi %13, %23 : vector<4x256xi32>
    %25 = arith.select %22, %24, %13 : vector<4x256xi1>, vector<4x256xi32>
    %c-1_i32 = arith.constant -1 : i32
    %26 = vector.broadcast %c-1_i32 : i32 to vector<4x256xi32>
    %27 = arith.addi %25, %26 : vector<4x256xi32>
    %c0_i32_12 = arith.constant 0 : i32
    %28 = vector.broadcast %c0_i32_12 : i32 to vector<4x256xi32>
    %29 = arith.cmpi sge, %27, %28 : vector<4x256xi32>
    %c-1_i32_13 = arith.constant -1 : i32
    %30 = vector.broadcast %c-1_i32_13 : i32 to vector<4x256xi32>
    %31 = arith.addi %25, %30 : vector<4x256xi32>
    %c16_i32_14 = arith.constant 16 : i32
    %32 = vector.broadcast %c16_i32_14 : i32 to vector<4x256xi32>
    %33 = arith.cmpi slt, %31, %32 : vector<4x256xi32>
    %34 = arith.andi %29, %33 : vector<4x256xi1>
    %35 = arith.extui %34 : vector<4x256xi1> to vector<4x256xi32>
    %36 = arith.sitofp %35 : vector<4x256xi32> to vector<4x256xf32>
    %c1_i32_15 = arith.constant 1 : i32
    %37 = vector.broadcast %c1_i32_15 : i32 to vector<4x256xi32>
    %38 = arith.addi %25, %37 : vector<4x256xi32>
    %c0_i32_16 = arith.constant 0 : i32
    %39 = vector.broadcast %c0_i32_16 : i32 to vector<4x256xi32>
    %40 = arith.cmpi sge, %38, %39 : vector<4x256xi32>
    %c1_i32_17 = arith.constant 1 : i32
    %41 = vector.broadcast %c1_i32_17 : i32 to vector<4x256xi32>
    %42 = arith.addi %25, %41 : vector<4x256xi32>
    %c16_i32_18 = arith.constant 16 : i32
    %43 = vector.broadcast %c16_i32_18 : i32 to vector<4x256xi32>
    %44 = arith.cmpi slt, %42, %43 : vector<4x256xi32>
    %45 = arith.andi %40, %44 : vector<4x256xi1>
    %46 = arith.extui %45 : vector<4x256xi1> to vector<4x256xi32>
    %47 = arith.sitofp %46 : vector<4x256xi32> to vector<4x256xf32>
    %c0_19 = arith.constant 0 : index
    %c111 = arith.constant 111 : index
    %48 = vector.load %arg4[%c0_19, %c111] : memref<4x512xf32, #tpu.memory_space<vmem>>, vector<4x256xf32>
    %49 = arith.mulf %48, %36 : vector<4x256xf32>
    %c0_20 = arith.constant 0 : index
    %c0_21 = arith.constant 0 : index
    %50 = vector.load %arg5[%c0_20, %c0_21] : memref<37x256xf32, #tpu.memory_space<vmem>>, vector<4x256xf32>
    tpu.vector_store %arg5[%c0_20, %c0_21], %49 {strides = array<i32>} : memref<37x256xf32, #tpu.memory_space<vmem>>, vector<4x256xf32>,
    %c0_22 = arith.constant 0 : index
    %c112 = arith.constant 112 : index
    %51 = vector.load %arg4[%c0_22, %c112] : memref<4x512xf32, #tpu.memory_space<vmem>>, vector<4x256xf32>
    %c4 = arith.constant 4 : index
    %c0_23 = arith.constant 0 : index
    %52 = vector.load %arg5[%c4, %c0_23] : memref<37x256xf32, #tpu.memory_space<vmem>>, vector<4x256xf32>
    tpu.vector_store %arg5[%c4, %c0_23], %51 {strides = array<i32>} : memref<37x256xf32, #tpu.memory_space<vmem>>, vector<4x256xf32>,
    %c0_24 = arith.constant 0 : index
    %c113 = arith.constant 113 : index
    %53 = vector.load %arg4[%c0_24, %c113] : memref<4x512xf32, #tpu.memory_space<vmem>>, vector<4x256xf32>
    %54 = arith.mulf %53, %47 : vector<4x256xf32>
    %c8 = arith.constant 8 : index
    %c0_25 = arith.constant 0 : index
    %55 = vector.load %arg5[%c8, %c0_25] : memref<37x256xf32, #tpu.memory_space<vmem>>, vector<4x256xf32>
    tpu.vector_store %arg5[%c8, %c0_25], %54 {strides = array<i32>} : memref<37x256xf32, #tpu.memory_space<vmem>>, vector<4x256xf32>,
    %c0_26 = arith.constant 0 : index
    %c127 = arith.constant 127 : index
    %56 = vector.load %arg4[%c0_26, %c127] : memref<4x512xf32, #tpu.memory_space<vmem>>, vector<4x256xf32>
    %57 = arith.mulf %56, %36 : vector<4x256xf32>
    %c12 = arith.constant 12 : index
    %c0_27 = arith.constant 0 : index
    %58 = vector.load %arg5[%c12, %c0_27] : memref<37x256xf32, #tpu.memory_space<vmem>>, vector<4x256xf32>
    tpu.vector_store %arg5[%c12, %c0_27], %57 {strides = array<i32>} : memref<37x256xf32, #tpu.memory_space<vmem>>, vector<4x256xf32>,
    %c0_28 = arith.constant 0 : index
    %c128_29 = arith.constant 128 : index
    %59 = vector.load %arg4[%c0_28, %c128_29] : memref<4x512xf32, #tpu.memory_space<vmem>>, vector<4x256xf32>
    %c16 = arith.constant 16 : index
    %c0_30 = arith.constant 0 : index
    %60 = vector.load %arg5[%c16, %c0_30] : memref<37x256xf32, #tpu.memory_space<vmem>>, vector<4x256xf32>
    tpu.vector_store %arg5[%c16, %c0_30], %59 {strides = array<i32>} : memref<37x256xf32, #tpu.memory_space<vmem>>, vector<4x256xf32>,
    %c0_31 = arith.constant 0 : index
    %c129 = arith.constant 129 : index
    %61 = vector.load %arg4[%c0_31, %c129] : memref<4x512xf32, #tpu.memory_space<vmem>>, vector<4x256xf32>
    %62 = arith.mulf %61, %47 : vector<4x256xf32>
    %c20 = arith.constant 20 : index
    %c0_32 = arith.constant 0 : index
    %63 = vector.load %arg5[%c20, %c0_32] : memref<37x256xf32, #tpu.memory_space<vmem>>, vector<4x256xf32>
    tpu.vector_store %arg5[%c20, %c0_32], %62 {strides = array<i32>} : memref<37x256xf32, #tpu.memory_space<vmem>>, vector<4x256xf32>,
    %c0_33 = arith.constant 0 : index
    %c143 = arith.constant 143 : index
    %64 = vector.load %arg4[%c0_33, %c143] : memref<4x512xf32, #tpu.memory_space<vmem>>, vector<4x256xf32>
    %65 = arith.mulf %64, %36 : vector<4x256xf32>
    %c24 = arith.constant 24 : index
    %c0_34 = arith.constant 0 : index
    %66 = vector.load %arg5[%c24, %c0_34] : memref<37x256xf32, #tpu.memory_space<vmem>>, vector<4x256xf32>
    tpu.vector_store %arg5[%c24, %c0_34], %65 {strides = array<i32>} : memref<37x256xf32, #tpu.memory_space<vmem>>, vector<4x256xf32>,
    %c0_35 = arith.constant 0 : index
    %c144 = arith.constant 144 : index
    %67 = vector.load %arg4[%c0_35, %c144] : memref<4x512xf32, #tpu.memory_space<vmem>>, vector<4x256xf32>
    %c28 = arith.constant 28 : index
    %c0_36 = arith.constant 0 : index
    %68 = vector.load %arg5[%c28, %c0_36] : memref<37x256xf32, #tpu.memory_space<vmem>>, vector<4x256xf32>
    tpu.vector_store %arg5[%c28, %c0_36], %67 {strides = array<i32>} : memref<37x256xf32, #tpu.memory_space<vmem>>, vector<4x256xf32>,
    %c0_37 = arith.constant 0 : index
    %c145 = arith.constant 145 : index
    %69 = vector.load %arg4[%c0_37, %c145] : memref<4x512xf32, #tpu.memory_space<vmem>>, vector<4x256xf32>
    %70 = arith.mulf %69, %47 : vector<4x256xf32>
    %c32 = arith.constant 32 : index
    %c0_38 = arith.constant 0 : index
    %71 = vector.load %arg5[%c32, %c0_38] : memref<37x256xf32, #tpu.memory_space<vmem>>, vector<4x256xf32>
    tpu.vector_store %arg5[%c32, %c0_38], %70 {strides = array<i32>} : memref<37x256xf32, #tpu.memory_space<vmem>>, vector<4x256xf32>,
    %c0_39 = arith.constant 0 : index
    %c0_40 = arith.constant 0 : index
    %72 = vector.load %arg2[%c0_39, %c0_40] : memref<8x37xf32, #tpu.memory_space<vmem>>, vector<8x37xf32>
    %c0_41 = arith.constant 0 : index
    %c0_42 = arith.constant 0 : index
    %73 = vector.load %arg5[%c0_41, %c0_42] : memref<37x256xf32, #tpu.memory_space<vmem>>, vector<37x256xf32>
    %cst_43 = arith.constant dense<0.000000e+00> : vector<8x256xf32>
    %74 = tpu.matmul %72, %73, %cst_43 {dimension_numbers = #tpu.dot_dimension_numbers<[1], [0], [0], [1], [0, 0, 1, 1], [], []>} : vector<8x37xf32>, vector<37x256xf32>, vector<8x256xf32> -> vector<8x256xf32>
    %cst_44 = arith.constant 0.000000e+00 : f32
    %75 = vector.broadcast %cst_44 : f32 to vector<8x256xf32>
    %76 = arith.maximumf %74, %75 : vector<8x256xf32>
    %c0_45 = arith.constant 0 : index
    %c0_46 = arith.constant 0 : index
    %c0_47 = arith.constant 0 : index
    %77 = vector.load %arg3[%c0_45, %c0_46, %c0_47] : memref<1x8x256xf32, #tpu.memory_space<vmem>>, vector<1x8x256xf32>
    %78 = vector.shape_cast %77 : vector<1x8x256xf32> to vector<8x256xf32>
    %79 = vector.shape_cast %76 : vector<8x256xf32> to vector<1x8x256xf32>
    tpu.vector_store %arg3[%c0_45, %c0_46, %c0_47], %79 {strides = array<i32>} : memref<1x8x256xf32, #tpu.memory_space<vmem>>, vector<1x8x256xf32>,
    return
  }
  func.func @transform_0(%arg0: i32) -> (i32, i32, i32) {
    %c0_i32 = arith.constant 0 : i32
    %c0_i32_0 = arith.constant 0 : i32
    %c0_i32_1 = arith.constant 0 : i32
    return %arg0, %c0_i32, %c0_i32_0 : i32, i32, i32
  }
  func.func @transform_1(%arg0: i32) -> (i32, i32) {
    %c0_i32 = arith.constant 0 : i32
    %c0_i32_0 = arith.constant 0 : i32
    %c0_i32_1 = arith.constant 0 : i32
    return %c0_i32, %c0_i32_0 : i32, i32
  }
  func.func @transform_2(%arg0: i32) -> (i32, i32, i32) {
    %c0_i32 = arith.constant 0 : i32
    %c0_i32_0 = arith.constant 0 : i32
    %c0_i32_1 = arith.constant 0 : i32
    return %arg0, %c0_i32, %c0_i32_0 : i32, i32, i32
  }
}

</mosaic_0001>

<bundles_post_ra>
// kernel: tpu_custom_call.1
= control target key start
LH: loop header
LB: loop body
LE: loop exit
PB: predicated region body
PF: predicated region fallthrough
CT: control target
= control target key end

     0   :  { %7 = vsyncpa [#allocation5], 0  ;;  %s1125_s0 = inlined_call_operand.hbm [shape: f32[2,4,256], index: 0, kind: input, shape index: {}]   ;;  %s1126_s1 = inlined_call_operand.hbm [shape: f32[8,37], index: 1, kind: input, shape index: {}]   ;;  %s1127_s2 = inlined_call_operand.hbm [shape: f32[2,8,256], index: 2, kind: output, shape index: {}]  }
   0x1   :  { %9 = vsyncpa [#allocation5 + $0x1], 0 }
   0x2   :  { %10 = vsyncpa [#allocation8], 0 }
   0x3   :  { %11 = vsyncpa [#allocation6], 0 }
   0x4   :  { %13 = vsyncpa [#allocation6 + $0x1], 0  ;;  %s883_s9 = smov 0   ;;  %s885_s10 = smov 0  }
   0x5   :  { %s887_s11 = smov 0   ;;  %s889_s12 = smov 0  }
   0x6 LB: > { %s904_s13 = sadd.s32 4294967295, %s853_s12   ;;  %s635_s14 = sadd.s32 4294967294, %s853_s12   ;;  %s853_s12 = sphi %s889_s12, %s1150_s12   ;;  %s849_s11 = sphi %s887_s11, %s1149_s11   ;;  %s845_s10 = sphi %s885_s10, %s1148_s10   ;;  %s841_s9 = sphi %s883_s9, %s1147_s9  }
   0x7   : > { %p39_p0 = scmp.ne.s32.totalorder %s845_s10, %s841_s9  ;;  %p1128_p1 = scmp.eq.s32.totalorder %s904_s13, 0 }
   0x8   : > { %p90_p3 = scmp.eq.s32.totalorder %s635_s14, 1  ;;  %p636_p5 = scmp.ge.s32.totalorder %s853_s12, 1 }
   0x9   : > { %p913_p4 = por %p1128_p1, %p39_p0  ;;  %p97_p7 = scmp.lt.s32.totalorder %s853_s12, 3 }
   0xa   : > { %p918_p6 = por %p90_p3, %p39_p0  ;;  %s855_s18 = smov [#allocation7]  }
   0xb   : > { %s1132_s15 = scalar_select %p913_p4, 1, 0 }
   0xc   : > { %s1133_s16 = scalar_select %p918_p6, 1, 0 }
   0xd   : > { %p923_p8 = pnand %p636_p5, %p97_p7  ;;  %s110_s19 = sshll.u32 %s855_s18, 4  ;;  %s111_s19 = int_to_ptr.vmem [resolvable:$true] %s110_s19 }
   0xe   : > { %s931_s20 = sadd.s32 1, %s853_s12   ;;  %s26_s24 = sadd.s32 1, %s849_s11 }
   0xf   : > { %s1134_s17 = scalar_select %p923_p8, 1, 0 }
  0x10   : > { %p668_p10 = pneg %p923_p8  ;;  %s23_s22 = ssub.s32 %s853_s12, %s931_s20 }
  0x11   : > { %p941_p12 = scmp.eq.s32.totalorder %s23_s22, 0  ;;  %p33_p13 = scmp.ne.s32.totalorder %s849_s11, %s845_s10 }
  0x12   : > { %p935_p11 = pnand %p668_p10, %p1128_p1  ;;  %s742_s25 = scalar_lea.vmem %s111_s19, 128 }
  0x13   : > { %p743_p3 = scmp.ne.s32.totalorder %s111_s19, %s742_s25  ;;  %p750_p9 = scmp.lt.s32.totalorder %s111_s19, %s111_s19 }
  0x14   : > { %p733_p0 = pneg %p935_p11  ;;  %p751_p2 = scmp.lt.s32.totalorder %s742_s25, %s742_s25 }
  0x16   : > { %p745_p5 = pnand %p743_p3, %p733_p0  ;;  %p752_p10 = por %p751_p2, %p750_p9 }
  0x18   : > { %p746_p7 = pneg %p745_p5 }
  0x1a   : > { %p753_p1 = pnand %p752_p10, %p746_p7 }
  0x1c   : > { %756 = shalt.err (!%p753_p1)
}
  0x1d   : > { %671 = dma.hbm_to_vmem [thread:$0]  (!%p935_p11), %s1126_s1, 128, %s111_s19, [#allocation8]  }
  0x1e   : > { %s958_s28 = scalar_select %p941_p12, %s849_s11, %s26_s24  }
  0x1f   : > { %p34_p1 = scmp.eq.s32.totalorder %s853_s12, 0  ;;  %p1137_p2 = scmp.eq.s32.totalorder %s904_s13, 1 }
  0x20   : > { %p681_p0 = scmp.lt.s32.totalorder %s853_s12, 2  ;;  %s121_s30 = sand.u32 1, %s849_s11  }
  0x21   : > { %p966_p9 = por %p1137_p2, %p33_p13  ;;  %p35_p3 = por %p34_p1, %p33_p13 }
  0x22   : > { %s639_s3 = sshll.u32 %s121_s30, 3  ;;  %s658_s4 = sshll.u32 %s853_s12, 7 }
  0x23   : > { %s1138_s29 = scalar_select %p966_p9, 1, 0 }
  0x24   : > { %s979_s7 = scalar_lea.hbm %s1125_s0, %s658_s4  ;;  %s125_s8 = scalar_lea.vmem [#allocation4], %s639_s3 }
  0x25   : > { %s133_s14 = sshll.u32 %s125_s8, 4  ;;  %p981_p11 = pnand %p681_p0, %p35_p3  ;;  %s134_s14 = int_to_ptr.vmem [resolvable:$true] %s133_s14 }
  0x26   : > { %s122_s19 = scalar_lea.sflag [#allocation5], %s121_s30  ;;  %s757_s21 = scalar_lea.hbm %s979_s7, 128 }
  0x27   : > { %p758_p12 = scmp.ne.s32.totalorder %s979_s7, %s757_s21  ;;  %p759_p13 = pneg %p981_p11 }
  0x28   : > { %s762_s24 = scalar_lea.hbm %s1125_s0, 256  ;;  %p763_p10 = scmp.lt.s32.totalorder %s979_s7, %s1125_s0 }
  0x29   : > { %p760_p5 = pnand %p759_p13, %p758_p12  ;;  %p764_p1 = scmp.lt.s32.totalorder %s762_s24, %s757_s21 }
  0x2b   : > { %p761_p7 = pneg %p760_p5  ;;  %p765_p2 = por %p764_p1, %p763_p10 }
  0x2d   : > { %p766_p0 = pnand %p765_p2, %p761_p7 }
  0x2f   : > { %769 = shalt.err (!%p766_p0)
}
  0x30   : > { %s770_s27 = scalar_lea.vmem %s134_s14, 128  ;;  %s856_s30 = smov [#allocation4]  }
  0x31   : > { %p771_p3 = scmp.ne.s32.totalorder %s134_s14, %s770_s27  ;;  %s775_s3 = sshll.u32 %s856_s30, 4  ;;  %s776_s3 = int_to_ptr.vmem [resolvable:$false] %s775_s3 }
  0x32   : > { %s777_s4 = scalar_lea.vmem %s776_s3, 256  ;;  %p778_p12 = scmp.lt.s32.totalorder %s134_s14, %s776_s3 }
  0x33   : > { %p773_p6 = pnand %p771_p3, %p759_p13  ;;  %p779_p5 = scmp.lt.s32.totalorder %s777_s4, %s770_s27 }
  0x35   : > { %p774_p9 = pneg %p773_p6  ;;  %p780_p4 = por %p779_p5, %p778_p12 }
  0x37   : > { %p781_p8 = pnand %p780_p4, %p774_p9 }
  0x39   : > { %784 = shalt.err (!%p781_p8)
}
  0x3a   : > { %675 = dma.hbm_to_vmem [thread:$0]  (!%p981_p11), %s979_s7, 128, %s134_s14, %s122_s19  }
  0x3b   : > { %p1140_p7 = scmp.ne.s32.totalorder %s1134_s17, 0 }
  0x3c   : > { %s1002_s5 = sand.u32 (!%p1140_p7), 1, %s845_s10   ;;  %p1141_p6 = scmp.ne.s32.totalorder (!%p1140_p7), %s1132_s15, 0 }
  0x3d   : > { %142 = sbr.rel (%p1140_p7) target bundleno = 572 (0x23c), region = 28  ;;  %s643_s6 = sshll.u32 (!%p1140_p7), %s1002_s5, 3 }
  0x3e   : > { %s145_s8 = scalar_lea.sflag (!%p1140_p7), [#allocation5], %s1002_s5  ;;  %s148_s21 = scalar_lea.vmem (!%p1140_p7), [#allocation4], %s643_s6 }
  0x42   : > { %828 = dma.done.wait (%p1141_p6), %s145_s8, 128  }
  0x43   : > { %830 = vsyncadd (%p1141_p6), %s145_s8, 4294967168  ;;  %v177_v0 = vlaneseq  ;;  %p1142_p4 = scmp.eq.s32.totalorder %s904_s13, 0 }
  0x45   : > { %832 = dma.done.wait (%p1142_p4), [#allocation8], 128   ;;  %p1143_p8 = pmov %p1142_p4 }
  0x46   : > { %v857_v1 = vmov 0.0   ;;  %v185_v2 = vand.u32 127, %v177_v0  ;;  %v1015_v8 = vld [vmem:[%s148_s21] sm:$0xff]  ;;  %s858_s15 = smov 1   ;;  %s859_s17 = smov 17   ;;  %vm258_vm4 = vcmask 138240  }
  0x47   : > { %834 = vsyncadd (%p1143_p8), [#allocation8], 4294967168  ;;  %173 = vst [vmem:[#allocation2] sm:$0xf] %v857_v1  ;;  %529 = vmatprep.mubr.f32.mxu0 %v857_v1  ;;  %s860_s7 = smov 113   ;;  %s861_s14 = smov 15   ;;  %v403_v18 = vcombine.low %v1015_v8, %v1015_v8  ;;  %v344_v47 = vcombine.high %v1015_v8, %v1015_v8 }
  0x48   : > { %174 = vst [vmem:[#allocation2 + $0xc] sm:$0xf] %v857_v1  ;;  %v186_v3 = vadd.s32 128, %v185_v2  ;;  %v191_v4 = vand.u32 15, %v185_v2  ;;  %176 = vst [vmem:[#allocation2 + $0x4] sm:$0xff] %v1015_v8  ;;  %s862_s18 = smov 111  }
  0x49   : > { %346 = vst [vmem:[#allocation3 + $0x20] sm:$0xf] %v1015_v8  ;;  %s863_s19 = smov 127   ;;  %s864_s22 = smov 112   ;;  %vm307_vm5 = vcmask 121856   ;;  %vm319_vm6 = vcmask 1039360  }
  0x4a   : > { %v198_v5 = vand.u32 15, %v186_v3  ;;  %v223_v6 = vadd.s32 1, %v191_v4  ;;  %v211_v7 = vadd.s32 4294967295, %v191_v4  ;;  %s865_s23 = smov 16   ;;  %vm411_vm7 = vcmask 916480   ;;  %s645_s24 = sshll.u32 %s1002_s5, 4 }
  0x4b   : > { %vm335_vm8 = vcmask 7168   ;;  %vm292_vm9 = vcmask 924672   ;;  %vm179_vm10 = vcmp.lt.s32.totalorder %v177_v0, 256  ;;  %347 = vst [vmem:[#allocation3 + $0x28] sm:$0xf] %v344_v47  ;;  %v866_v57 = vmov 1.0  }
  0x4c   : > { %v224_v9 = vadd.s32 1, %v198_v5  ;;  %vm227_vm0 = vcmp.lt.s32.totalorder %v223_v6, 16  ;;  %v212_v10 = vadd.s32 4294967295, %v198_v5  ;;  %vm213_vm1 = vcmp.ge.s32.totalorder %v211_v7, 0  ;;  %s659_s25 = sshll.u32 %s904_s13, 8  ;;  %s172_s26 = scalar_lea.vmem [#allocation9], %s645_s24 }
  0x4d   : > { %v648_v11 = vsel %vm227_vm0, 1.0, %v857_v1  ;;  %v646_v13 = vsel %vm213_vm1, 1.0, %v857_v1  ;;  %182 = vst.msk [vmem:[#allocation3 + $0x44] ss:$8 sm:$0x3] %vm179_vm10, %v866_v57  ;;  %vm277_vm11 = vcmask 130048   ;;  %s553_s4 = scalar_lea.hbm %s1127_s2, %s659_s25 }
  0x4e   : > { %vm228_vm2 = vcmp.lt.s32.totalorder %v224_v9, 16  ;;  %vm214_vm3 = vcmp.ge.s32.totalorder %v212_v10, 0  ;;  %vm243_vm12 = vcmask 908288   ;;  %vm458_vm13 = vcmask 1044480   ;;  %s555_s27 = sshll.u32 %s172_s26, 4  ;;  %s541_s6 = scalar_lea.sflag [#allocation6], %s1002_s5  ;;  %s556_s27 = int_to_ptr.vmem [resolvable:$true] %s555_s27 }
  0x4f   : > { %v649_v12 = vsel %vm228_vm2, 1.0, %v857_v1  ;;  %v647_v14 = vsel %vm214_vm3, 1.0, %v857_v1  ;;  %v727_v17 = vld [vmem:[#allocation2 + $0xc] ss:$0 sps:$4 sm:$0xff]   ;;  %v729_v19 = vld [vmem:[#allocation2 + $0x8] ss:$0 sps:$4 sm:$0xff]  }
  0x50   : > { %v288_v15 = vcombine.low %v648_v11, %v649_v12  ;;  %v239_v16 = vcombine.low %v646_v13, %v647_v14  ;;  %v1029_v20 = vld [vmem:[#allocation2] sm:$0xff]  ;;  %v419_v23 = vld [vmem:[#allocation2 + $0xc] sm:$0xf]  ;;  %v285_v27 = vld [vmem:[#allocation2 + $0x8] sm:$0xf]  ;;  %vm454_vm14 = vcmask 302080  }
  0x51   : > { %v375_v29 = vld [vmem:[#allocation2 + $0xc] sm:$0xf]  ;;  %v236_v36 = vld [vmem:[#allocation2 + $0x8] sm:$0xf]  ;;  %v269_v11 = vcombine.low %v1029_v20, %v1029_v20  ;;  %s785_s8 = scalar_lea.vmem %s556_s27, 256  ;;  %p1144_p11 = scmp.ne.s32.totalorder %s1138_s29, 0 }
  0x52   : > { %350 = vrot.lane.b32.xlu1 %v288_v15, %s858_s15  ;;  %420 = vrot.lane.b32.xlu0 %v288_v15, %s859_s17  ;;  %v349_v51 = vld [vmem:[#allocation2 + $0xc] sm:$0xf]  ;;  %v315_v54 = vld [vmem:[#allocation2 + $0x8] sm:$0xf]  ;;  %p786_p9 = scmp.ne.s32.totalorder %s556_s27, %s785_s8  ;;  %s867_s21 = smov [#allocation9]  }
  0x53   : > { %s789_s13 = sshll.u32 %s867_s21, 4  ;;  %s790_s13 = int_to_ptr.vmem [resolvable:$false] %s789_s13 }
  0x54   : > { %p787_p13 = pnand %p786_p9, %p1144_p11  ;;  %p792_p1 = scmp.lt.s32.totalorder %s556_s27, %s790_s13 }
  0x56   : > { %289 = vrot.lane.b32.xlu1 %v288_v15, %s860_s7  ;;  %376 = vrot.lane.b32.xlu0 %v239_v16, %s861_s14  ;;  %p788_p10 = pneg %p787_p13 }
  0x5a   : > { %240 = vrot.lane.b32.xlu1 %v239_v16, %s862_s18  ;;  %316 = vrot.lane.b32.xlu0 %v239_v16, %s863_s19 }
  0x5e   : > { %409 = vrot.lane.b32.xlu0 %v727_v17, %s864_s22  ;;  %407 = vrot.lane.b32.xlu1 %v1015_v8, %s864_s22 }
  0x62   : > { %405 = vrot.lane.b32.xlu0 %v403_v18, %s864_s22  ;;  %275 = vrot.lane.b32.xlu1 %v729_v19, %s865_s23 }
  0x66   : > { %273 = vrot.lane.b32.xlu0 %v1029_v20, %s865_s23 }
  0xc4   : > { %v351_v21 = vpop.permute.xlu1 %350  ;;  %v421_v22 = vpop.permute.xlu0 %420 }
  0xc5   : > { %v422_v24 = vrot.slane %v421_v22, 4  ;;  %v352_v42 = vrot.slane %v351_v21, 4 }
  0xc7   : > { %v427_v25 = vmul.f32 %v422_v24, %v419_v23  ;;  %v423_v34 = vsel %vm258_vm4, %v422_v24, %v421_v22  ;;  %v353_v52 = vsel %vm335_vm8, %v352_v42, %v351_v21  ;;  %v357_v60 = vmul.f32 %v352_v42, %v349_v51 }
  0xc8   : > { %v290_v26 = vpop.permute.xlu1 %289  ;;  %v377_v28 = vpop.permute.xlu0 %376  ;;  %v426_v40 = vmul.f32 %v423_v34, %v1015_v8  ;;  %v356_v59 = vmul.f32 %v353_v52, %v1015_v8 }
  0xc9   : > { %v291_v30 = vrot.slane %v290_v26, 4  ;;  %v378_v31 = vrot.slane %v377_v28, 4  ;;  %435 = vrot.lane.b32.xlu1 %v427_v25, %s862_s18  ;;  %v361_v2 = vcombine.low %v357_v60, %v357_v60 }
  0xca   : > { %v430_v4 = vcombine.high %v426_v40, %v426_v40  ;;  %v360_v7 = vcombine.low %v356_v59, %v356_v59 }
  0xcb   : > { %v297_v32 = vmul.f32 %v291_v30, %v285_v27  ;;  %v383_v33 = vmul.f32 %v378_v31, %v375_v29  ;;  %v379_v43 = vsel %vm307_vm5, %v378_v31, %v377_v28  ;;  %v293_v53 = vsel %vm292_vm9, %v291_v30, %v290_v26 }
  0xcc   : > { %v241_v35 = vpop.permute.xlu1 %240  ;;  %v317_v37 = vpop.permute.xlu0 %316  ;;  %v382_v49 = vmul.f32 %v379_v43, %v1015_v8  ;;  %v296_v61 = vmul.f32 %v293_v53, %v1029_v20  ;;  %v443_v53 = vld [vmem:[#allocation7] sm:$0xff] }
  0xcd   : > { %v242_v38 = vrot.slane %v241_v35, 4  ;;  %v318_v39 = vrot.slane %v317_v37, 4  ;;  %305 = vrot.lane.b32.xlu1 %v297_v32, %s861_s14  ;;  %391 = vrot.lane.b32.xlu0 %v383_v33, %s860_s7 }
  0xce   : > { %v386_v3 = vcombine.high %v382_v49, %v382_v49  ;;  %v300_v8 = vcombine.high %v296_v61, %v296_v61 }
  0xcf   : > { %v248_v41 = vmul.f32 %v242_v38, %v236_v36  ;;  %v320_v44 = vsel %vm319_vm6, %v318_v39, %v317_v37  ;;  %v324_v62 = vmul.f32 %v318_v39, %v315_v54  ;;  %v244_v5 = vsel %vm243_vm12, %v242_v38, %v241_v35 }
  0xd0   : > { %v410_v45 = vpop.permute.xlu0 %409  ;;  %v408_v46 = vpop.permute.xlu1 %407  ;;  %v323_v50 = vmul.f32 %v320_v44, %v1029_v20  ;;  %v247_v6 = vmul.f32 %v1029_v20, %v244_v5 }
  0xd1   : > { %256 = vrot.lane.b32.xlu1 %v248_v41, %s859_s17  ;;  %431 = vrot.lane.b32.xlu0 %v426_v40, %s862_s18  ;;  %v413_v48 = vsel %vm411_vm7, %v408_v46, %v410_v45  ;;  %v328_v1 = vcombine.low %v324_v62, %v324_v62 }
  0xd2   : > { %417 = vst [vmem:[#allocation3 + $0x38] sm:$0xf0] %v413_v48  ;;  %v327_v9 = vcombine.low %v323_v50, %v323_v50  ;;  %v251_v10 = vcombine.high %v247_v6, %v247_v6 }
  0xd4   : > { %v406_v55 = vpop.permute.xlu0 %405  ;;  %v276_v58 = vpop.permute.xlu1 %275 }
  0xd5   : > { %387 = vrot.lane.b32.xlu1 %v382_v49, %s860_s7  ;;  %331 = vrot.lane.b32.xlu0 %v323_v50, %s858_s15  ;;  %v412_v56 = vsel %vm411_vm7, %v406_v55, %v408_v46 }
  0xd6   : > { %416 = vst [vmem:[#allocation3 + $0x30] sm:$0xf0] %v412_v56 }
  0xd8   : > { %v1055_v63 = vpop.permute.xlu0 %273 }
  0xd9   : > { %364 = vrot.lane.b32.xlu1 %v356_v59, %s863_s19  ;;  %301 = vrot.lane.b32.xlu0 %v296_v61, %s861_s14  ;;  %v279_v0 = vsel %vm277_vm11, %v1055_v63, %v276_v58 }
  0xda   : > { %283 = vst [vmem:[#allocation3 + $0x8] sm:$0xf0] %v279_v0 }
  0xdd   : > { %333 = vrot.lane.b32.xlu1 %v328_v1, %s858_s15  ;;  %366 = vrot.lane.b32.xlu0 %v361_v2, %s863_s19 }
  0xe1   : > { %389 = vrot.lane.b32.xlu1 %v386_v3, %s860_s7  ;;  %433 = vrot.lane.b32.xlu0 %v430_v4, %s862_s18 }
  0xe5   : > { %362 = vrot.lane.b32.xlu1 %v360_v7, %s863_s19  ;;  %303 = vrot.lane.b32.xlu0 %v300_v8, %s861_s14 }
  0xe9   : > { %329 = vrot.lane.b32.xlu1 %v327_v9, %s858_s15  ;;  %254 = vrot.lane.b32.xlu0 %v251_v10, %s859_s17  ;;  %s791_s15 = scalar_lea.vmem %s790_s13, 512 }
  0xea   : > { %p793_p2 = scmp.lt.s32.totalorder %s791_s15, %s785_s8 }
  0xec   : > { %p794_p0 = por %p793_p2, %p792_p1 }
  0xed   : > { %271 = vrot.lane.b32.xlu1 %v269_v11, %s865_s23  ;;  %252 = vrot.lane.b32.xlu0 %v247_v6, %s859_s17 }
  0xee   : > { %p795_p3 = pnand %p794_p0, %p788_p10 }
 0x13b   : > { %v436_v12 = vpop.permute.xlu1 %435 }
 0x13f   : > { %v306_v13 = vpop.permute.xlu1 %305  ;;  %v392_v14 = vpop.permute.xlu0 %391 }
 0x143   : > { %v257_v15 = vpop.permute.xlu1 %256  ;;  %v432_v16 = vpop.permute.xlu0 %431 }
 0x147   : > { %v388_v17 = vpop.permute.xlu1 %387  ;;  %v332_v18 = vpop.permute.xlu0 %331 }
 0x14b   : > { %v365_v19 = vpop.permute.xlu1 %364  ;;  %v302_v21 = vpop.permute.xlu0 %301 }
 0x14f   : > { %v334_v22 = vpop.permute.xlu1 %333  ;;  %v367_v23 = vpop.permute.xlu0 %366 }
 0x150   : > { %v337_v20 = vsel %vm335_vm8, %v332_v18, %v334_v22  ;;  %v369_v24 = vsel %vm319_vm6, %v365_v19, %v367_v23 }
 0x151   : > { %341 = vst [vmem:[#allocation3 + $0x18] sm:$0xf0] %v337_v20  ;;  %373 = vst [vmem:[#allocation3 + $0x28] sm:$0xf0] %v369_v24 }
 0x153   : > { %v390_v25 = vpop.permute.xlu1 %389  ;;  %v434_v26 = vpop.permute.xlu0 %433 }
 0x154   : > { %v393_v27 = vsel %vm292_vm9, %v388_v17, %v390_v25  ;;  %v394_v28 = vsel %vm292_vm9, %v390_v25, %v392_v14  ;;  %v437_v29 = vsel %vm243_vm12, %v432_v16, %v434_v26  ;;  %v438_v30 = vsel %vm243_vm12, %v434_v26, %v436_v12 }
 0x155   : > { %397 = vst [vmem:[#allocation3 + $0x30] sm:$0xf] %v393_v27  ;;  %398 = vst [vmem:[#allocation3 + $0x38] sm:$0xf] %v394_v28 }
 0x156   : > { %441 = vst [vmem:[#allocation3 + $0x40] sm:$0xf] %v437_v29  ;;  %442 = vst [vmem:[#allocation3 + $0x48] sm:$0xf] %v438_v30 }
 0x157   : > { %v363_v31 = vpop.permute.xlu1 %362  ;;  %v304_v32 = vpop.permute.xlu0 %303 }
 0x158   : > { %v368_v33 = vsel %vm319_vm6, %v363_v31, %v365_v19  ;;  %v308_v34 = vsel %vm307_vm5, %v302_v21, %v304_v32  ;;  %v309_v35 = vsel %vm307_vm5, %v304_v32, %v306_v13  ;;  %v449_v48 = vld [vmem:[#allocation3 + $0x28] sm:$0xff] }
 0x159   : > { %372 = vst [vmem:[#allocation3 + $0x20] sm:$0xf0] %v368_v33  ;;  %312 = vst [vmem:[#allocation3 + $0x10] sm:$0xf] %v308_v34 }
 0x15a   : > { %313 = vst [vmem:[#allocation3 + $0x18] sm:$0xf] %v309_v35 }
 0x15b   : > { %v330_v36 = vpop.permute.xlu1 %329  ;;  %v255_v37 = vpop.permute.xlu0 %254 }
 0x15c   : > { %v336_v38 = vsel %vm335_vm8, %v330_v36, %v332_v18  ;;  %v260_v39 = vsel %vm258_vm4, %v255_v37, %v257_v15  ;;  %v451_v42 = vld [vmem:[#allocation3 + $0x38] sm:$0xff]  ;;  %v450_v45 = vld [vmem:[#allocation3 + $0x30] sm:$0xff] }
 0x15d   : > { %v453_v40 = vld [vmem:[#allocation3 + $0x48] sm:$0x1f]  ;;  %v452_v41 = vld [vmem:[#allocation3 + $0x40] sm:$0x1f]  ;;  %340 = vst [vmem:[#allocation3 + $0x10] sm:$0xf0] %v336_v38 }
 0x15e   : > { %264 = vst [vmem:[#allocation3 + $0x8] sm:$0xf] %v260_v39  ;;  %650 = vmatprep.subr.msk.mxu0 %vm458_vm13, %v453_v40 }
 0x15f   : > { %651 = vmatpush1.msk.msra.mxu0 %vm458_vm13, %v452_v41  ;;  %v272_v43 = vpop.permute.xlu1 %271  ;;  %v253_v44 = vpop.permute.xlu0 %252 }
 0x160   : > { %489 = vmatprep.subr.mxu0 %v451_v42  ;;  %v278_v46 = vsel %vm277_vm11, %v272_v43, %v1055_v63  ;;  %v259_v47 = vsel %vm258_vm4, %v253_v44, %v255_v37  ;;  %v448_v49 = vld [vmem:[#allocation3 + $0x20] sm:$0xff] }
 0x161   : > { %490 = vmatpush1.msra.mxu0 %v450_v45  ;;  %282 = vst [vmem:[#allocation3] sm:$0xf0] %v278_v46  ;;  %263 = vst [vmem:[#allocation3] sm:$0xf] %v259_v47  ;;  %v447_v50 = vld [vmem:[#allocation3 + $0x18] sm:$0xff] }
 0x162   : > { %491 = vmatprep.subr.mxu0 %v449_v48 }
 0x163   : > { %492 = vmatpush1.msra.mxu0 %v448_v49 }
 0x164   : > { %493 = vmatprep.subr.mxu0 %v447_v50  ;;  %v446_v51 = vld [vmem:[#allocation3 + $0x10] sm:$0xff] }
 0x165   : > { %v445_v52 = vld [vmem:[#allocation3 + $0x8] sm:$0xff]  ;;  %494 = vmatpush1.msra.mxu0 %v446_v51 }
 0x166   : > { %495 = vmatprep.subr.mxu0 %v445_v52 }
 0x168   : > { %v444_v54 = vld [vmem:[#allocation3] sm:$0xff] }
 0x169   : > { %496 = vmatpush1.msra.mxu0 %v444_v54 }
 0x16a   : > { %652 = vmatmul.mubr.msk.f32.vlgmr.msra.gmra.mxu0 %vm454_vm14, %v443_v53 }
 0x22a   : > { %v531_v55 = vpop.f32.mrf.mxu0 }
 0x22b   : > { %v536_v56 = vmax.f32 %v531_v55, 0.0 }
 0x22c   : > { %v533_v57 = vpop.f32.mrf.mxu0 }
 0x22d   : > { %538 = vst [vmem:[%s172_s26] sm:$0xff] %v536_v56  ;;  %v537_v58 = vmax.f32 %v533_v57, 0.0 }
 0x22f   : > { %539 = vst [vmem:[%s172_s26 + $0x8] sm:$0xff] %v537_v58 }
 0x230   : > { %798 = shalt.err (!%p795_p3)
}
 0x231   : > { %s799_s17 = scalar_lea.hbm %s553_s4, 256  ;;  %s803_s14 = scalar_lea.hbm %s1127_s2, 512 }
 0x232   : > { %p800_p12 = scmp.ne.s32.totalorder %s553_s4, %s799_s17  ;;  %p804_p6 = scmp.lt.s32.totalorder %s553_s4, %s1127_s2 }
 0x233   : > { %p805_p4 = scmp.lt.s32.totalorder %s803_s14, %s799_s17 }
 0x234   : > { %p801_p5 = pnand %p800_p12, %p1144_p11 }
 0x235   : > { %p806_p8 = por %p805_p4, %p804_p6 }
 0x236   : > { %p802_p7 = pneg %p801_p5 }
 0x238   : > { %p807_p9 = pnand %p806_p8, %p802_p7 }
 0x23a   : > { %810 = shalt.err (!%p807_p9)
}
 0x23b   : > { %666 = dma.vmem_to_hbm [thread:$0]  (%p1144_p11), %s556_s27, 256, %s553_s4, %s541_s6  }
 0x23c PF: > { %s567_s22 = sand.u32 1, %s841_s9   ;;  %p1145_p13 = scmp.ne.s32.totalorder %s1133_s16, 0 }
 0x23d   : > { %p1146_p10 = scmp.ge.s32.totalorder %s853_s12, 2  ;;  %s568_s23 = scalar_lea.sflag [#allocation6], %s567_s22 }
 0x23f   : > { %p677_p1 = pnand %p1146_p10, %p1145_p13 }
 0x241   : > { %p678_p2 = pneg %p677_p1 }
 0x243   : > { %836 = dma.done.wait (%p678_p2), %s568_s23, 256  }
 0x244   : > { %838 = vsyncadd (%p678_p2), %s568_s23, 4294967040  ;;  %p16_p0 = scmp.ge.s32.totalorder %s931_s20, 4   ;;  %s1147_s9 = smov %s845_s10 }
 0x245   : > { %s1148_s10 = smov %s849_s11  ;;  %s1149_s11 = smov %s958_s28 }
 0x246   : > { %s1150_s12 = smov %s931_s20  ;;  %18 = sbr.rel (!%p16_p0) target bundleno = 6 (0x6), region = 78 }
 0x24b   :  { %573 = vsyncpa [#allocation5], 1 }
 0x24c   :  { %575 = vsyncpa [#allocation5 + $0x1], 1 }
 0x24d   :  { %576 = vsyncpa [#allocation8], 1 }
 0x24e   :  { %577 = vsyncpa [#allocation6], 1 }
 0x24f   :  { %579 = vsyncpa [#allocation6 + $0x1], 1 }

</bundles_post_ra>
